<compile_context>
chip_gen: v6e
topology: v6e:2x2x1
jax: 0.10.0
libtpu: 0.0.40
codegen_flags: <defaults>
</compile_context>

<pallas_src>
import functools

import jax
import jax.numpy as jnp
from jax.experimental import pallas as pl
from jax.experimental.pallas import tpu as pltpu


def _readout_dma_kernel(o_hbm, out_hbm, sem, *, chunks):
    """Copy `o_hbm` -> `out_hbm` with direct HBM->HBM DMAs (no VMEM staging).

    `chunks` is a static tuple of (row_start, row_size) pairs; all DMAs are
    issued first, then waited on, so they can overlap in the DMA engine.
    """
    copies = []
    for i, (start, size) in enumerate(chunks):
        cp = pltpu.make_async_copy(
            o_hbm.at[pl.ds(start, size)],
            out_hbm.at[pl.ds(start, size)],
            sem.at[i],
        )
        cp.start()
        copies.append(cp)
    for cp in copies:
        cp.wait()


def _row_chunks(n_rows: int, max_chunks: int = 4):
    """Split [0, n_rows) into at most `max_chunks` contiguous static chunks."""
    n = max(1, min(max_chunks, n_rows))
    base, rem = divmod(n_rows, n)
    chunks = []
    start = 0
    for i in range(n):
        size = base + (1 if i < rem else 0)
        if size == 0:
            continue
        chunks.append((start, size))
        start += size
    return tuple(chunks)


def readout(o: jax.Array, *, copy: bool = True) -> jax.Array:
    """Pallas implementation of ReadOut.forward for o of shape (N, C).

    The reference forward is a no-op stub; this returns the input unchanged.
    With copy=False the kernel is elided entirely (zero HBM traffic); with
    copy=True a fresh, bit-identical buffer is produced by HBM->HBM DMA.
    """
    if not copy:
        return o

    N, C = o.shape
    itemsize = jnp.dtype(o.dtype).itemsize
    chunks = _row_chunks(N)

    kernel = functools.partial(_readout_dma_kernel, chunks=chunks)

    return pl.pallas_call(
        kernel,
        out_shape=jax.ShapeDtypeStruct((N, C), o.dtype),
        in_specs=[pl.BlockSpec(memory_space=pl.ANY)],
        out_specs=pl.BlockSpec(memory_space=pl.ANY),
        scratch_shapes=[pltpu.SemaphoreType.DMA((len(chunks),))],
        cost_estimate=pl.CostEstimate(
            flops=0,
            transcendentals=0,
            bytes_accessed=2 * N * C * itemsize,
        ),
    )(o)


if __name__ == "__main__":
    key = jax.random.PRNGKey(0)
    # Small (N, C) consistent with the module's forward signature.
    N, C = 16, 128
    o = jax.random.normal(key, (N, C), dtype=jnp.float32)

    out = readout(o)
    jax.block_until_ready(out)

    # Identity semantics check (the stub forward does no compute).
    assert out.shape == (N, C)
    assert out.dtype == o.dtype
    assert bool(jnp.array_equal(out, o))

    # Ragged / non-multiple-of-8 row count and bf16 dtype, exercising the
    # chunked-DMA path with uneven static chunks.
    o2 = jax.random.normal(key, (20, 256), dtype=jnp.bfloat16)
    out2 = readout(o2)
    jax.block_until_ready(out2)
    assert bool(jnp.array_equal(out2, o2))

    # Zero-traffic path (op is a semantic no-op).
    out3 = readout(o, copy=False)
    assert out3 is o

    print("KERNEL_OK")
</pallas_src>

<mosaic_0001>
module attributes {stable_mosaic.version = 11 : i64} {
  func.func @_readout_dma_kernel(%arg0: memref<16x128xf32, #tpu.memory_space<any>>, %arg1: memref<16x128xf32, #tpu.memory_space<any>>, %arg2: memref<4x!tpu.dma_semaphore, #tpu.memory_space<semaphore_mem>>) attributes {dimension_semantics = [], scalar_prefetch = 0 : i64, scratch_operands = 1 : i64, tpu.core_type = #tpu.core_type<tc>} {
    %c0_i32 = arith.constant 0 : i32
    %c0_i32_0 = arith.constant 0 : i32
    %c0_i32_1 = arith.constant 0 : i32
    %0 = tpu.memref_slice %arg0[%c0_i32_0, %c0_i32_1] : memref<16x128xf32, #tpu.memory_space<any>> -> memref<4x128xf32, #tpu.memory_space<any>>
    %c0_i32_2 = arith.constant 0 : i32
    %c0_i32_3 = arith.constant 0 : i32
    %1 = tpu.memref_slice %arg1[%c0_i32_2, %c0_i32_3] : memref<16x128xf32, #tpu.memory_space<any>> -> memref<4x128xf32, #tpu.memory_space<any>>
    %2 = tpu.memref_slice %arg2[%c0_i32] : memref<4x!tpu.dma_semaphore, #tpu.memory_space<semaphore_mem>> -> memref<1x!tpu.dma_semaphore, #tpu.memory_space<semaphore_mem>>
    %3 = tpu.memref_squeeze %2 : memref<1x!tpu.dma_semaphore, #tpu.memory_space<semaphore_mem>> -> memref<!tpu.dma_semaphore, #tpu.memory_space<semaphore_mem>>
    tpu.enqueue_dma source(%0 : memref<4x128xf32, #tpu.memory_space<any>>) target(%1 : memref<4x128xf32, #tpu.memory_space<any>>) target_semaphore(%3 : memref<!tpu.dma_semaphore, #tpu.memory_space<semaphore_mem>>)
    %c1_i32 = arith.constant 1 : i32
    %c4_i32 = arith.constant 4 : i32
    %c0_i32_4 = arith.constant 0 : i32
    %4 = tpu.memref_slice %arg0[%c4_i32, %c0_i32_4] : memref<16x128xf32, #tpu.memory_space<any>> -> memref<4x128xf32, #tpu.memory_space<any>>
    %c4_i32_5 = arith.constant 4 : i32
    %c0_i32_6 = arith.constant 0 : i32
    %5 = tpu.memref_slice %arg1[%c4_i32_5, %c0_i32_6] : memref<16x128xf32, #tpu.memory_space<any>> -> memref<4x128xf32, #tpu.memory_space<any>>
    %6 = tpu.memref_slice %arg2[%c1_i32] : memref<4x!tpu.dma_semaphore, #tpu.memory_space<semaphore_mem>> -> memref<1x!tpu.dma_semaphore, #tpu.memory_space<semaphore_mem>>
    %7 = tpu.memref_squeeze %6 : memref<1x!tpu.dma_semaphore, #tpu.memory_space<semaphore_mem>> -> memref<!tpu.dma_semaphore, #tpu.memory_space<semaphore_mem>>
    tpu.enqueue_dma source(%4 : memref<4x128xf32, #tpu.memory_space<any>>) target(%5 : memref<4x128xf32, #tpu.memory_space<any>>) target_semaphore(%7 : memref<!tpu.dma_semaphore, #tpu.memory_space<semaphore_mem>>)
    %c2_i32 = arith.constant 2 : i32
    %c8_i32 = arith.constant 8 : i32
    %c0_i32_7 = arith.constant 0 : i32
    %8 = tpu.memref_slice %arg0[%c8_i32, %c0_i32_7] : memref<16x128xf32, #tpu.memory_space<any>> -> memref<4x128xf32, #tpu.memory_space<any>>
    %c8_i32_8 = arith.constant 8 : i32
    %c0_i32_9 = arith.constant 0 : i32
    %9 = tpu.memref_slice %arg1[%c8_i32_8, %c0_i32_9] : memref<16x128xf32, #tpu.memory_space<any>> -> memref<4x128xf32, #tpu.memory_space<any>>
    %10 = tpu.memref_slice %arg2[%c2_i32] : memref<4x!tpu.dma_semaphore, #tpu.memory_space<semaphore_mem>> -> memref<1x!tpu.dma_semaphore, #tpu.memory_space<semaphore_mem>>
    %11 = tpu.memref_squeeze %10 : memref<1x!tpu.dma_semaphore, #tpu.memory_space<semaphore_mem>> -> memref<!tpu.dma_semaphore, #tpu.memory_space<semaphore_mem>>
    tpu.enqueue_dma source(%8 : memref<4x128xf32, #tpu.memory_space<any>>) target(%9 : memref<4x128xf32, #tpu.memory_space<any>>) target_semaphore(%11 : memref<!tpu.dma_semaphore, #tpu.memory_space<semaphore_mem>>)
    %c3_i32 = arith.constant 3 : i32
    %c12_i32 = arith.constant 12 : i32
    %c0_i32_10 = arith.constant 0 : i32
    %12 = tpu.memref_slice %arg0[%c12_i32, %c0_i32_10] : memref<16x128xf32, #tpu.memory_space<any>> -> memref<4x128xf32, #tpu.memory_space<any>>
    %c12_i32_11 = arith.constant 12 : i32
    %c0_i32_12 = arith.constant 0 : i32
    %13 = tpu.memref_slice %arg1[%c12_i32_11, %c0_i32_12] : memref<16x128xf32, #tpu.memory_space<any>> -> memref<4x128xf32, #tpu.memory_space<any>>
    %14 = tpu.memref_slice %arg2[%c3_i32] : memref<4x!tpu.dma_semaphore, #tpu.memory_space<semaphore_mem>> -> memref<1x!tpu.dma_semaphore, #tpu.memory_space<semaphore_mem>>
    %15 = tpu.memref_squeeze %14 : memref<1x!tpu.dma_semaphore, #tpu.memory_space<semaphore_mem>> -> memref<!tpu.dma_semaphore, #tpu.memory_space<semaphore_mem>>
    tpu.enqueue_dma source(%12 : memref<4x128xf32, #tpu.memory_space<any>>) target(%13 : memref<4x128xf32, #tpu.memory_space<any>>) target_semaphore(%15 : memref<!tpu.dma_semaphore, #tpu.memory_space<semaphore_mem>>)
    %c0_i32_13 = arith.constant 0 : i32
    %c0_i32_14 = arith.constant 0 : i32
    %c0_i32_15 = arith.constant 0 : i32
    %16 = tpu.memref_slice %arg0[%c0_i32_14, %c0_i32_15] : memref<16x128xf32, #tpu.memory_space<any>> -> memref<4x128xf32, #tpu.memory_space<any>>
    %c0_i32_16 = arith.constant 0 : i32
    %c0_i32_17 = arith.constant 0 : i32
    %17 = tpu.memref_slice %arg1[%c0_i32_16, %c0_i32_17] : memref<16x128xf32, #tpu.memory_space<any>> -> memref<4x128xf32, #tpu.memory_space<any>>
    %18 = tpu.memref_slice %arg2[%c0_i32_13] : memref<4x!tpu.dma_semaphore, #tpu.memory_space<semaphore_mem>> -> memref<1x!tpu.dma_semaphore, #tpu.memory_space<semaphore_mem>>
    %19 = tpu.memref_squeeze %18 : memref<1x!tpu.dma_semaphore, #tpu.memory_space<semaphore_mem>> -> memref<!tpu.dma_semaphore, #tpu.memory_space<semaphore_mem>>
    tpu.wait_dma2 semaphore(%19 : memref<!tpu.dma_semaphore, #tpu.memory_space<semaphore_mem>>) src(%16 : memref<4x128xf32, #tpu.memory_space<any>>) dst(%17 : memref<4x128xf32, #tpu.memory_space<any>>)
    %c1_i32_18 = arith.constant 1 : i32
    %c4_i32_19 = arith.constant 4 : i32
    %c0_i32_20 = arith.constant 0 : i32
    %20 = tpu.memref_slice %arg0[%c4_i32_19, %c0_i32_20] : memref<16x128xf32, #tpu.memory_space<any>> -> memref<4x128xf32, #tpu.memory_space<any>>
    %c4_i32_21 = arith.constant 4 : i32
    %c0_i32_22 = arith.constant 0 : i32
    %21 = tpu.memref_slice %arg1[%c4_i32_21, %c0_i32_22] : memref<16x128xf32, #tpu.memory_space<any>> -> memref<4x128xf32, #tpu.memory_space<any>>
    %22 = tpu.memref_slice %arg2[%c1_i32_18] : memref<4x!tpu.dma_semaphore, #tpu.memory_space<semaphore_mem>> -> memref<1x!tpu.dma_semaphore, #tpu.memory_space<semaphore_mem>>
    %23 = tpu.memref_squeeze %22 : memref<1x!tpu.dma_semaphore, #tpu.memory_space<semaphore_mem>> -> memref<!tpu.dma_semaphore, #tpu.memory_space<semaphore_mem>>
    tpu.wait_dma2 semaphore(%23 : memref<!tpu.dma_semaphore, #tpu.memory_space<semaphore_mem>>) src(%20 : memref<4x128xf32, #tpu.memory_space<any>>) dst(%21 : memref<4x128xf32, #tpu.memory_space<any>>)
    %c2_i32_23 = arith.constant 2 : i32
    %c8_i32_24 = arith.constant 8 : i32
    %c0_i32_25 = arith.constant 0 : i32
    %24 = tpu.memref_slice %arg0[%c8_i32_24, %c0_i32_25] : memref<16x128xf32, #tpu.memory_space<any>> -> memref<4x128xf32, #tpu.memory_space<any>>
    %c8_i32_26 = arith.constant 8 : i32
    %c0_i32_27 = arith.constant 0 : i32
    %25 = tpu.memref_slice %arg1[%c8_i32_26, %c0_i32_27] : memref<16x128xf32, #tpu.memory_space<any>> -> memref<4x128xf32, #tpu.memory_space<any>>
    %26 = tpu.memref_slice %arg2[%c2_i32_23] : memref<4x!tpu.dma_semaphore, #tpu.memory_space<semaphore_mem>> -> memref<1x!tpu.dma_semaphore, #tpu.memory_space<semaphore_mem>>
    %27 = tpu.memref_squeeze %26 : memref<1x!tpu.dma_semaphore, #tpu.memory_space<semaphore_mem>> -> memref<!tpu.dma_semaphore, #tpu.memory_space<semaphore_mem>>
    tpu.wait_dma2 semaphore(%27 : memref<!tpu.dma_semaphore, #tpu.memory_space<semaphore_mem>>) src(%24 : memref<4x128xf32, #tpu.memory_space<any>>) dst(%25 : memref<4x128xf32, #tpu.memory_space<any>>)
    %c3_i32_28 = arith.constant 3 : i32
    %c12_i32_29 = arith.constant 12 : i32
    %c0_i32_30 = arith.constant 0 : i32
    %28 = tpu.memref_slice %arg0[%c12_i32_29, %c0_i32_30] : memref<16x128xf32, #tpu.memory_space<any>> -> memref<4x128xf32, #tpu.memory_space<any>>
    %c12_i32_31 = arith.constant 12 : i32
    %c0_i32_32 = arith.constant 0 : i32
    %29 = tpu.memref_slice %arg1[%c12_i32_31, %c0_i32_32] : memref<16x128xf32, #tpu.memory_space<any>> -> memref<4x128xf32, #tpu.memory_space<any>>
    %30 = tpu.memref_slice %arg2[%c3_i32_28] : memref<4x!tpu.dma_semaphore, #tpu.memory_space<semaphore_mem>> -> memref<1x!tpu.dma_semaphore, #tpu.memory_space<semaphore_mem>>
    %31 = tpu.memref_squeeze %30 : memref<1x!tpu.dma_semaphore, #tpu.memory_space<semaphore_mem>> -> memref<!tpu.dma_semaphore, #tpu.memory_space<semaphore_mem>>
    tpu.wait_dma2 semaphore(%31 : memref<!tpu.dma_semaphore, #tpu.memory_space<semaphore_mem>>) src(%28 : memref<4x128xf32, #tpu.memory_space<any>>) dst(%29 : memref<4x128xf32, #tpu.memory_space<any>>)
    return
  }
}

</mosaic_0001>

<bundles_post_ra>
// kernel: tpu_custom_call.1
= control target key start
LH: loop header
LB: loop body
LE: loop exit
PB: predicated region body
PF: predicated region fallthrough
CT: control target
= control target key end

     0   :  { %s97_s9 = smov [#allocation2]   ;;  %s98_s10 = smov 131072   ;;  %s137_s0 = inlined_call_operand.hbm [shape: f32[16,128], index: 0, kind: input, shape index: {}]   ;;  %s138_s1 = inlined_call_operand.hbm [shape: f32[16,128], index: 1, kind: output, shape index: {}]  }
   0x1   :  { %s13_s8 = scalar_lea.hbm %s137_s0, 64  ;;  %s99_s11 = smov 0  }
   0x2   :  { %12 = dma.general %s137_s0, 64, %s138_s1, %s97_s9, %s98_s10, [#allocation4], %s99_s11, 0  }
   0x3   :  { %s14_s18 = scalar_lea.hbm %s138_s1, 64  ;;  %s100_s19 = smov [#allocation2 + $0x1]  }
   0x4   :  { %22 = dma.general %s13_s8, 64, %s14_s18, %s100_s19, %s98_s10, [#allocation6], %s99_s11, 0  }
   0x5   :  { %s23_s22 = scalar_lea.hbm %s137_s0, 128  ;;  %s24_s25 = scalar_lea.hbm %s138_s1, 128 }
   0x6   :  { %s33_s28 = scalar_lea.hbm %s137_s0, 192  ;;  %s101_s29 = smov [#allocation2 + $0x2]  }
   0x7   :  { %32 = dma.general %s23_s22, 64, %s24_s25, %s101_s29, %s98_s10, [#allocation8], %s99_s11, 0  }
   0x8   :  { %s34_s3 = scalar_lea.hbm %s138_s1, 192  ;;  %s102_s4 = smov [#allocation2 + $0x3]  }
   0x9   :  { %42 = dma.general %s33_s28, 64, %s34_s3, %s102_s4, %s98_s10, [#allocation10], %s99_s11, 0  }
   0xa   :  { %89 = dma.done.wait [#allocation2], 64 }
   0xb   :  { %90 = vsyncadd [#allocation2], 4294967232 }
   0xc   :  { %91 = dma.done.wait [#allocation2 + $0x1], 64 }
   0xd   :  { %92 = vsyncadd [#allocation2 + $0x1], 4294967232 }
   0xe   :  { %93 = dma.done.wait [#allocation2 + $0x2], 64 }
   0xf   :  { %94 = vsyncadd [#allocation2 + $0x2], 4294967232 }
  0x10   :  { %95 = dma.done.wait [#allocation2 + $0x3], 64 }
  0x11   :  { %96 = vsyncadd [#allocation2 + $0x3], 4294967232 }
  0x12   :  { %52 = vsyncmov [#allocation2] }
  0x15   :  { %s53_s5 = vpop.sfrf %52 }
  0x16   :  { %p79_p0 = scmp.ne.s32.totalorder %s53_s5, 0 }
  0x18   :  { %57 = shalt.err (%p79_p0)  }
  0x19   :  { %59 = vsyncmov [#allocation2 + $0x1] }
  0x1c   :  { %s60_s0 = vpop.sfrf %59 }
  0x1d   :  { %p80_p1 = scmp.ne.s32.totalorder %s60_s0, 0 }
  0x1f   :  { %64 = shalt.err (%p80_p1)  }
  0x20   :  { %66 = vsyncmov [#allocation2 + $0x2] }
  0x23   :  { %s67_s1 = vpop.sfrf %66 }
  0x24   :  { %p81_p2 = scmp.ne.s32.totalorder %s67_s1, 0 }
  0x26   :  { %71 = shalt.err (%p81_p2)  }
  0x27   :  { %73 = vsyncmov [#allocation2 + $0x3] }
  0x2a   :  { %s74_s6 = vpop.sfrf %73 }
  0x2b   :  { %p82_p3 = scmp.ne.s32.totalorder %s74_s6, 0 }
  0x2d   :  { %78 = shalt.err (%p82_p3)  }

</bundles_post_ra>
